<compile_context>
chip_gen: v7x
topology: tpu7x:2x2x1
jax: 0.10.0
libtpu: 0.0.40
codegen_flags: <defaults>
</compile_context>

<pallas_src>
import functools

import jax
import jax.numpy as jnp
from jax.experimental import pallas as pl
from jax.experimental.pallas import tpu as pltpu

LN_EPS = 1e-5  # PyTorch nn.LayerNorm default


def _round_up(x, m):
    return (x + m - 1) // m * m


def _layernorm(x, gamma, beta):
    mean = jnp.mean(x, axis=-1, keepdims=True)
    var = jnp.mean(jnp.square(x - mean), axis=-1, keepdims=True)
    inv = jax.lax.rsqrt(var + LN_EPS)
    return (x - mean) * inv * gamma + beta


def _gelu_exact(x):
    # PyTorch nn.GELU() default = exact erf form.
    return 0.5 * x * (1.0 + jax.lax.erf(x * 0.7071067811865476))


def _vmem_budget_bytes(frac=0.85, fallback=64 * 1024 * 1024):
    """Physical VMEM capacity with headroom (v5e/v6e: 128 MiB, v7x: 64 MiB per TC)."""
    try:
        cap = int(pltpu.get_tpu_info().vmem_capacity_bytes)
    except Exception:
        cap = fallback
    return int(cap * frac)


# --------------------------------------------------------------------------------------
# Kernel 1: hidden MLP  (Linear 2D->2D, LN, GELU, Linear 2D->D, LN, GELU)
# --------------------------------------------------------------------------------------
def _hidden_mlp_kernel(x_ref,
                       w1_ref, b1_ref, g1_ref, be1_ref,
                       w2_ref, b2_ref, g2_ref, be2_ref,
                       h_ref):
    x = x_ref[...].astype(w1_ref.dtype)
    h = jnp.dot(x, w1_ref[...], preferred_element_type=jnp.float32) + b1_ref[...]
    h = _gelu_exact(_layernorm(h, g1_ref[...], be1_ref[...]))
    # Dropout -> identity at inference.
    h = jnp.dot(h.astype(w2_ref.dtype), w2_ref[...],
                preferred_element_type=jnp.float32) + b2_ref[...]
    h = _gelu_exact(_layernorm(h, g2_ref[...], be2_ref[...]))
    h_ref[...] = h.astype(h_ref.dtype)


# --------------------------------------------------------------------------------------
# Kernel 2: streamed classifier  (Linear D->T, /temperature folded in, clamp)
# --------------------------------------------------------------------------------------
def _classifier_kernel(h_ref, w3_ref, b3_ref, o_ref):
    logits = jnp.dot(h_ref[...], w3_ref[...],
                     preferred_element_type=jnp.float32) + b3_ref[...]
    o_ref[...] = jnp.clip(logits, -15.0, 15.0).astype(o_ref.dtype)


@functools.partial(jax.jit, static_argnames=("block_b", "tag_block", "out_dtype"))
def refined_emb_to_pred(features, params, *, block_b=None, tag_block=4096,
                        out_dtype=jnp.float32):
    """features: (B, 2*D) f32; params: output of prepare_params(). Returns (B, total_tags)."""
    B, twoD = features.shape
    D = twoD // 2
    T = params["b3"].shape[1]
    w_dtype = params["w3"].dtype
    w_bytes = jnp.dtype(w_dtype).itemsize
    out_bytes = jnp.dtype(out_dtype).itemsize

    # --- batch tiling (pad B up to a sublane-friendly block) ---
    if block_b is None:
        block_b = min(128, _round_up(B, 8))
    block_b = _round_up(block_b, 8)
    B_pad = _round_up(B, block_b)

    # --- tag tiling (lane-dense, multiple of 128; w3 is streamed over this axis) ---
    tn = min(_round_up(T, 128), _round_up(tag_block, 128))
    T_pad = _round_up(T, tn)

    x = features
    if B_pad != B:
        x = jnp.pad(x, ((0, B_pad - B), (0, 0)))
    w3, b3 = params["w3"], params["b3"]
    if T_pad != T:
        w3 = jnp.pad(w3, ((0, 0), (0, T_pad - T)))
        b3 = jnp.pad(b3, ((0, 0), (0, T_pad - T)))

    n_b = B_pad // block_b
    n_t = T_pad // tn

    vmem_budget = _vmem_budget_bytes()

    # ------------------------ kernel 1: hidden MLP ------------------------
    full = lambda i: (0, 0)
    mlp_est = (2 * block_b * twoD * 4                        # x block (double-buffered)
               + 2 * (twoD * twoD + twoD * D) * w_bytes      # w1, w2
               + 2 * 3 * (twoD + D) * 4                      # biases + LN params
               + 2 * block_b * D * w_bytes)                  # h output block
    mlp_cost = pl.CostEstimate(
        flops=2 * B_pad * (twoD * twoD + twoD * D),
        transcendentals=B_pad * (twoD + D),
        bytes_accessed=(B_pad * twoD * 4
                        + n_b * (twoD * twoD + twoD * D) * w_bytes
                        + B_pad * D * w_bytes))

    h = pl.pallas_call(
        _hidden_mlp_kernel,
        out_shape=jax.ShapeDtypeStruct((B_pad, D), w_dtype),
        grid_spec=pltpu.PrefetchScalarGridSpec(
            num_scalar_prefetch=0,
            grid=(n_b,),
            in_specs=[
                pl.BlockSpec((block_b, twoD), lambda i: (i, 0)),   # x
                pl.BlockSpec((twoD, twoD), full),                  # w1
                pl.BlockSpec((1, twoD), full),                     # b1
                pl.BlockSpec((1, twoD), full),                     # ln1 gamma
                pl.BlockSpec((1, twoD), full),                     # ln1 beta
                pl.BlockSpec((twoD, D), full),                     # w2
                pl.BlockSpec((1, D), full),                        # b2
                pl.BlockSpec((1, D), full),                        # ln2 gamma
                pl.BlockSpec((1, D), full),                        # ln2 beta
            ],
            out_specs=pl.BlockSpec((block_b, D), lambda i: (i, 0)),
        ),
        compiler_params=pltpu.CompilerParams(
            dimension_semantics=("parallel",),
            vmem_limit_bytes=int(min(max(int(mlp_est * 1.3), 16 * 1024 * 1024),
                                     vmem_budget))),
        cost_estimate=mlp_cost,
    )(x,
      params["w1"], params["b1"], params["g1"], params["be1"],
      params["w2"], params["b2"], params["g2"], params["be2"])

    # --------------------- kernel 2: streamed classifier ---------------------
    cls_est = (2 * block_b * D * w_bytes                     # h block
               + 2 * (D * tn * w_bytes + tn * 4)             # streamed w3 tile + b3 tile
               + 2 * block_b * tn * out_bytes)               # output tile
    cls_cost = pl.CostEstimate(
        flops=2 * B_pad * D * T_pad,
        transcendentals=0,
        bytes_accessed=(D * T_pad * w_bytes                  # w3 read exactly once (tag outer)
                        + n_t * B_pad * D * w_bytes          # h re-read per tag tile (tiny)
                        + T_pad * 4
                        + B_pad * T_pad * out_bytes))

    out = pl.pallas_call(
        _classifier_kernel,
        out_shape=jax.ShapeDtypeStruct((B_pad, T_pad), out_dtype),
        grid_spec=pltpu.PrefetchScalarGridSpec(
            num_scalar_prefetch=0,
            # Tag axis OUTER: the w3 tile's block index is constant across the inner batch loop,
            # so the dominant (D, T) weight is streamed from HBM exactly once, independent of n_b.
            grid=(n_t, n_b),
            in_specs=[
                pl.BlockSpec((block_b, D), lambda j, i: (i, 0)),   # h
                pl.BlockSpec((D, tn),      lambda j, i: (0, j)),   # w3 tile (streamed over T)
                pl.BlockSpec((1, tn),      lambda j, i: (0, j)),   # b3 tile
            ],
            out_specs=pl.BlockSpec((block_b, tn), lambda j, i: (i, j)),
        ),
        compiler_params=pltpu.CompilerParams(
            # No cross-step dependency -> both axes parallel; on v7x the large tag axis
            # shards across the 2 TensorCores even at small batch.
            dimension_semantics=("parallel", "parallel"),
            vmem_limit_bytes=int(min(max(int(cls_est * 1.5), 16 * 1024 * 1024),
                                     vmem_budget))),
        cost_estimate=cls_cost,
    )(h, w3, b3)

    return out[:B, :T]


def prepare_params(raw, weight_dtype=jnp.bfloat16):
    """Fold 1/temperature into the classifier and cast the big matrices to `weight_dtype`.

    The classifier is w3-HBM-bandwidth bound at production shapes, so bf16 weights ~halve wall
    clock. Pass weight_dtype=jnp.float32 to keep exact f32 semantics.
    """
    f32 = jnp.float32
    inv_t = (1.0 / raw["temperature"].astype(f32).reshape(())).astype(f32)
    return {
        "w1": raw["w1"].astype(weight_dtype),
        "b1": raw["b1"].astype(f32),
        "g1": raw["g1"].astype(f32),
        "be1": raw["be1"].astype(f32),
        "w2": raw["w2"].astype(weight_dtype),
        "b2": raw["b2"].astype(f32),
        "g2": raw["g2"].astype(f32),
        "be2": raw["be2"].astype(f32),
        "w3": (raw["w3"].astype(f32) * inv_t).astype(weight_dtype),
        "b3": (raw["b3"].astype(f32) * inv_t),
    }


def init_params(key, embedding_dim, total_tags):
    """Deterministic synthetic parameters matching the refined_classifier shapes (f32)."""
    D = embedding_dim
    k = jax.random.split(key, 6)
    scale1 = 1.0 / jnp.sqrt(2.0 * D)
    scale2 = 1.0 / jnp.sqrt(2.0 * D)
    scale3 = 1.0 / jnp.sqrt(1.0 * D)
    return {
        "w1": jax.random.normal(k[0], (2 * D, 2 * D), jnp.float32) * scale1,
        "b1": jax.random.normal(k[1], (1, 2 * D), jnp.float32) * 0.01,
        "g1": jnp.ones((1, 2 * D), jnp.float32),
        "be1": jnp.zeros((1, 2 * D), jnp.float32),
        "w2": jax.random.normal(k[2], (2 * D, D), jnp.float32) * scale2,
        "b2": jax.random.normal(k[3], (1, D), jnp.float32) * 0.01,
        "g2": jnp.ones((1, D), jnp.float32),
        "be2": jnp.zeros((1, D), jnp.float32),
        "w3": jax.random.normal(k[4], (D, total_tags), jnp.float32) * scale3,
        "b3": jax.random.normal(k[5], (1, total_tags), jnp.float32) * 0.01,
        "temperature": jnp.full((1, 1), 1.5, jnp.float32),  # nn.Parameter(torch.ones(1) * 1.5)
    }


def _reference_f32(features, p):
    """Pure-f32, PyTorch-faithful math (raw params, explicit division by temperature)."""
    h = features @ p["w1"] + p["b1"]
    h = _gelu_exact(_layernorm(h, p["g1"], p["be1"]))
    h = h @ p["w2"] + p["b2"]
    h = _gelu_exact(_layernorm(h, p["g2"], p["be2"]))
    logits = h @ p["w3"] + p["b3"]
    return jnp.clip(logits / p["temperature"].reshape(()), -15.0, 15.0)


def _reference_prepared(features, p):
    """Mirrors the kernel's numerics (quantized weights/activations, f32 accumulate)."""
    f32 = jnp.float32
    wdt = p["w1"].dtype
    h = features.astype(wdt).astype(f32) @ p["w1"].astype(f32) + p["b1"]
    h = _gelu_exact(_layernorm(h, p["g1"], p["be1"]))
    h = h.astype(wdt).astype(f32) @ p["w2"].astype(f32) + p["b2"]
    h = _gelu_exact(_layernorm(h, p["g2"], p["be2"]))
    logits = h.astype(p["w3"].dtype).astype(f32) @ p["w3"].astype(f32) + p["b3"]
    return jnp.clip(logits, -15.0, 15.0)


if __name__ == "__main__":
    # Small shapes consistent with the module: embedding_dim=D, input (B, 2*D), output (B, T).
    B = 6              # deliberately not a multiple of 8 -> exercises batch padding
    D = 128            # scaled-down embedding_dim (real model uses 1280)
    TOTAL_TAGS = 320   # scaled-down total_tags (real model ~70k); not a multiple of the tag tile

    key = jax.random.PRNGKey(0)
    k_feat, k_par = jax.random.split(key)
    features = jax.random.normal(k_feat, (B, 2 * D), jnp.float32)
    raw_params = init_params(k_par, D, TOTAL_TAGS)
    params = prepare_params(raw_params, weight_dtype=jnp.bfloat16)

    # Small tag tile so the demo exercises multi-tile streaming of w3.
    out = refined_emb_to_pred(features, params, tag_block=128)
    out = jax.block_until_ready(out)
    assert out.shape == (B, TOTAL_TAGS)

    # Tight check against a reference that mirrors the kernel's bf16-weight numerics.
    ref_exact = _reference_prepared(features, params)
    err = float(jnp.max(jnp.abs(out - ref_exact)))
    assert err < 2e-3, err

    # Loose sanity check against the full-f32 PyTorch-faithful math (bf16 quantization noise).
    ref_f32 = _reference_f32(features, raw_params)
    err32 = float(jnp.max(jnp.abs(out - ref_f32)))
    assert err32 < 0.5, err32

    # Also exercise multiple batch blocks (n_b > 1) with the tag-outer grid ordering.
    B2 = 20
    features2 = jax.random.normal(jax.random.PRNGKey(1), (B2, 2 * D), jnp.float32)
    out2 = jax.block_until_ready(
        refined_emb_to_pred(features2, params, block_b=8, tag_block=128))
    assert out2.shape == (B2, TOTAL_TAGS)
    ref2 = _reference_prepared(features2, params)
    err2 = float(jnp.max(jnp.abs(out2 - ref2)))
    assert err2 < 2e-3, err2

    print("KERNEL_OK")
</pallas_src>

<mosaic_0001>
module attributes {stable_mosaic.version = 11 : i64} {
  func.func @_hidden_mlp_kernel(%arg0: i32, %arg1: memref<8x256xf32, #tpu.memory_space<vmem>>, %arg2: memref<256x256xbf16, #tpu.memory_space<vmem>>, %arg3: memref<1x256xf32, #tpu.memory_space<vmem>>, %arg4: memref<1x256xf32, #tpu.memory_space<vmem>>, %arg5: memref<1x256xf32, #tpu.memory_space<vmem>>, %arg6: memref<256x128xbf16, #tpu.memory_space<vmem>>, %arg7: memref<1x128xf32, #tpu.memory_space<vmem>>, %arg8: memref<1x128xf32, #tpu.memory_space<vmem>>, %arg9: memref<1x128xf32, #tpu.memory_space<vmem>>, %arg10: memref<8x128xbf16, #tpu.memory_space<vmem>>) attributes {dimension_semantics = [#tpu.dimension_semantics<parallel>], iteration_bounds = array<i64: 1>, scalar_prefetch = 0 : i64, scratch_operands = 0 : i64, tpu.core_type = #tpu.core_type<tc>, window_params = [{transform_indices = @transform_0, window_bounds = array<i64: 8, 256>}, {pipeline_mode = #tpu.pipeline_mode<synchronous>, transform_indices = @transform_1, window_bounds = array<i64: 256, 256>}, {pipeline_mode = #tpu.pipeline_mode<synchronous>, transform_indices = @transform_2, window_bounds = array<i64: 1, 256>}, {pipeline_mode = #tpu.pipeline_mode<synchronous>, transform_indices = @transform_3, window_bounds = array<i64: 1, 256>}, {pipeline_mode = #tpu.pipeline_mode<synchronous>, transform_indices = @transform_4, window_bounds = array<i64: 1, 256>}, {pipeline_mode = #tpu.pipeline_mode<synchronous>, transform_indices = @transform_5, window_bounds = array<i64: 256, 128>}, {pipeline_mode = #tpu.pipeline_mode<synchronous>, transform_indices = @transform_6, window_bounds = array<i64: 1, 128>}, {pipeline_mode = #tpu.pipeline_mode<synchronous>, transform_indices = @transform_7, window_bounds = array<i64: 1, 128>}, {pipeline_mode = #tpu.pipeline_mode<synchronous>, transform_indices = @transform_8, window_bounds = array<i64: 1, 128>}, {transform_indices = @transform_9, window_bounds = array<i64: 8, 128>}]} {
    %c0 = arith.constant 0 : index
    %c0_0 = arith.constant 0 : index
    %0 = vector.load %arg1[%c0, %c0_0] : memref<8x256xf32, #tpu.memory_space<vmem>>, vector<8x256xf32>
    %1 = arith.truncf %0 : vector<8x256xf32> to vector<8x256xbf16>
    %c0_1 = arith.constant 0 : index
    %c0_2 = arith.constant 0 : index
    %2 = vector.load %arg2[%c0_1, %c0_2] : memref<256x256xbf16, #tpu.memory_space<vmem>>, vector<256x256xbf16>
    %cst = arith.constant dense<0.000000e+00> : vector<8x256xf32>
    %3 = tpu.matmul %1, %2, %cst {dimension_numbers = #tpu.dot_dimension_numbers<[1], [0], [0], [1], [0, 0, 1, 1], [], []>} : vector<8x256xbf16>, vector<256x256xbf16>, vector<8x256xf32> -> vector<8x256xf32>
    %c0_3 = arith.constant 0 : index
    %c0_4 = arith.constant 0 : index
    %4 = vector.load %arg3[%c0_3, %c0_4] : memref<1x256xf32, #tpu.memory_space<vmem>>, vector<1x256xf32>
    %5 = vector.broadcast %4 : vector<1x256xf32> to vector<8x256xf32>
    %6 = arith.addf %3, %5 : vector<8x256xf32>
    %c0_5 = arith.constant 0 : index
    %c0_6 = arith.constant 0 : index
    %7 = vector.load %arg4[%c0_5, %c0_6] : memref<1x256xf32, #tpu.memory_space<vmem>>, vector<1x256xf32>
    %c0_7 = arith.constant 0 : index
    %c0_8 = arith.constant 0 : index
    %8 = vector.load %arg5[%c0_7, %c0_8] : memref<1x256xf32, #tpu.memory_space<vmem>>, vector<1x256xf32>
    %cst_9 = arith.constant dense<0.000000e+00> : vector<8xf32>
    %9 = vector.multi_reduction <add>, %6, %cst_9 [1] : vector<8x256xf32> to vector<8xf32>
    %10 = vector.shape_cast %9 : vector<8xf32> to vector<8x1xf32>
    %cst_10 = arith.constant 2.560000e+02 : f32
    %11 = vector.broadcast %cst_10 : f32 to vector<8x1xf32>
    %12 = arith.divf %10, %11 : vector<8x1xf32>
    %13 = vector.broadcast %12 : vector<8x1xf32> to vector<8x256xf32>
    %14 = arith.subf %6, %13 : vector<8x256xf32>
    %15 = arith.mulf %14, %14 : vector<8x256xf32>
    %cst_11 = arith.constant dense<0.000000e+00> : vector<8xf32>
    %16 = vector.multi_reduction <add>, %15, %cst_11 [1] : vector<8x256xf32> to vector<8xf32>
    %17 = vector.shape_cast %16 : vector<8xf32> to vector<8x1xf32>
    %cst_12 = arith.constant 2.560000e+02 : f32
    %18 = vector.broadcast %cst_12 : f32 to vector<8x1xf32>
    %19 = arith.divf %17, %18 : vector<8x1xf32>
    %cst_13 = arith.constant 9.99999974E-6 : f32
    %20 = vector.broadcast %cst_13 : f32 to vector<8x1xf32>
    %21 = arith.addf %19, %20 : vector<8x1xf32>
    %22 = math.rsqrt %21 : vector<8x1xf32>
    %23 = vector.broadcast %12 : vector<8x1xf32> to vector<8x256xf32>
    %24 = arith.subf %6, %23 : vector<8x256xf32>
    %25 = vector.broadcast %22 : vector<8x1xf32> to vector<8x256xf32>
    %26 = arith.mulf %24, %25 : vector<8x256xf32>
    %27 = vector.broadcast %7 : vector<1x256xf32> to vector<8x256xf32>
    %28 = arith.mulf %26, %27 : vector<8x256xf32>
    %29 = vector.broadcast %8 : vector<1x256xf32> to vector<8x256xf32>
    %30 = arith.addf %28, %29 : vector<8x256xf32>
    %cst_14 = arith.constant 5.000000e-01 : f32
    %31 = vector.broadcast %cst_14 : f32 to vector<8x256xf32>
    %32 = arith.mulf %31, %30 : vector<8x256xf32>
    %cst_15 = arith.constant 0.707106769 : f32
    %33 = vector.broadcast %cst_15 : f32 to vector<8x256xf32>
    %34 = arith.mulf %30, %33 : vector<8x256xf32>
    %35 = math.erf %34 : vector<8x256xf32>
    %cst_16 = arith.constant 1.000000e+00 : f32
    %36 = vector.broadcast %cst_16 : f32 to vector<8x256xf32>
    %37 = arith.addf %36, %35 : vector<8x256xf32>
    %38 = arith.mulf %32, %37 : vector<8x256xf32>
    %39 = arith.truncf %38 : vector<8x256xf32> to vector<8x256xbf16>
    %c0_17 = arith.constant 0 : index
    %c0_18 = arith.constant 0 : index
    %40 = vector.load %arg6[%c0_17, %c0_18] : memref<256x128xbf16, #tpu.memory_space<vmem>>, vector<256x128xbf16>
    %cst_19 = arith.constant dense<0.000000e+00> : vector<8x128xf32>
    %41 = tpu.matmul %39, %40, %cst_19 {dimension_numbers = #tpu.dot_dimension_numbers<[1], [0], [0], [1], [0, 0, 1, 1], [], []>} : vector<8x256xbf16>, vector<256x128xbf16>, vector<8x128xf32> -> vector<8x128xf32>
    %c0_20 = arith.constant 0 : index
    %c0_21 = arith.constant 0 : index
    %42 = vector.load %arg7[%c0_20, %c0_21] : memref<1x128xf32, #tpu.memory_space<vmem>>, vector<1x128xf32>
    %43 = vector.broadcast %42 : vector<1x128xf32> to vector<8x128xf32>
    %44 = arith.addf %41, %43 : vector<8x128xf32>
    %c0_22 = arith.constant 0 : index
    %c0_23 = arith.constant 0 : index
    %45 = vector.load %arg8[%c0_22, %c0_23] : memref<1x128xf32, #tpu.memory_space<vmem>>, vector<1x128xf32>
    %c0_24 = arith.constant 0 : index
    %c0_25 = arith.constant 0 : index
    %46 = vector.load %arg9[%c0_24, %c0_25] : memref<1x128xf32, #tpu.memory_space<vmem>>, vector<1x128xf32>
    %cst_26 = arith.constant dense<0.000000e+00> : vector<8xf32>
    %47 = vector.multi_reduction <add>, %44, %cst_26 [1] : vector<8x128xf32> to vector<8xf32>
    %48 = vector.shape_cast %47 : vector<8xf32> to vector<8x1xf32>
    %cst_27 = arith.constant 1.280000e+02 : f32
    %49 = vector.broadcast %cst_27 : f32 to vector<8x1xf32>
    %50 = arith.divf %48, %49 : vector<8x1xf32>
    %51 = vector.broadcast %50 : vector<8x1xf32> to vector<8x128xf32>
    %52 = arith.subf %44, %51 : vector<8x128xf32>
    %53 = arith.mulf %52, %52 : vector<8x128xf32>
    %cst_28 = arith.constant dense<0.000000e+00> : vector<8xf32>
    %54 = vector.multi_reduction <add>, %53, %cst_28 [1] : vector<8x128xf32> to vector<8xf32>
    %55 = vector.shape_cast %54 : vector<8xf32> to vector<8x1xf32>
    %cst_29 = arith.constant 1.280000e+02 : f32
    %56 = vector.broadcast %cst_29 : f32 to vector<8x1xf32>
    %57 = arith.divf %55, %56 : vector<8x1xf32>
    %cst_30 = arith.constant 9.99999974E-6 : f32
    %58 = vector.broadcast %cst_30 : f32 to vector<8x1xf32>
    %59 = arith.addf %57, %58 : vector<8x1xf32>
    %60 = math.rsqrt %59 : vector<8x1xf32>
    %61 = vector.broadcast %50 : vector<8x1xf32> to vector<8x128xf32>
    %62 = arith.subf %44, %61 : vector<8x128xf32>
    %63 = vector.broadcast %60 : vector<8x1xf32> to vector<8x128xf32>
    %64 = arith.mulf %62, %63 : vector<8x128xf32>
    %65 = vector.broadcast %45 : vector<1x128xf32> to vector<8x128xf32>
    %66 = arith.mulf %64, %65 : vector<8x128xf32>
    %67 = vector.broadcast %46 : vector<1x128xf32> to vector<8x128xf32>
    %68 = arith.addf %66, %67 : vector<8x128xf32>
    %cst_31 = arith.constant 5.000000e-01 : f32
    %69 = vector.broadcast %cst_31 : f32 to vector<8x128xf32>
    %70 = arith.mulf %69, %68 : vector<8x128xf32>
    %cst_32 = arith.constant 0.707106769 : f32
    %71 = vector.broadcast %cst_32 : f32 to vector<8x128xf32>
    %72 = arith.mulf %68, %71 : vector<8x128xf32>
    %73 = math.erf %72 : vector<8x128xf32>
    %cst_33 = arith.constant 1.000000e+00 : f32
    %74 = vector.broadcast %cst_33 : f32 to vector<8x128xf32>
    %75 = arith.addf %74, %73 : vector<8x128xf32>
    %76 = arith.mulf %70, %75 : vector<8x128xf32>
    %77 = arith.truncf %76 : vector<8x128xf32> to vector<8x128xbf16>
    %c0_34 = arith.constant 0 : index
    %c0_35 = arith.constant 0 : index
    %78 = vector.load %arg10[%c0_34, %c0_35] : memref<8x128xbf16, #tpu.memory_space<vmem>>, vector<8x128xbf16>
    tpu.vector_store %arg10[%c0_34, %c0_35], %77 {strides = array<i32>} : memref<8x128xbf16, #tpu.memory_space<vmem>>, vector<8x128xbf16>,
    return
  }
  func.func @transform_0(%arg0: i32) -> (i32, i32) {
    %c0_i32 = arith.constant 0 : i32
    %c0_i32_0 = arith.constant 0 : i32
    return %arg0, %c0_i32 : i32, i32
  }
  func.func @transform_1(%arg0: i32) -> (i32, i32) {
    %c0_i32 = arith.constant 0 : i32
    %c0_i32_0 = arith.constant 0 : i32
    %c0_i32_1 = arith.constant 0 : i32
    return %c0_i32, %c0_i32_0 : i32, i32
  }
  func.func @transform_2(%arg0: i32) -> (i32, i32) {
    %c0_i32 = arith.constant 0 : i32
    %c0_i32_0 = arith.constant 0 : i32
    %c0_i32_1 = arith.constant 0 : i32
    return %c0_i32, %c0_i32_0 : i32, i32
  }
  func.func @transform_3(%arg0: i32) -> (i32, i32) {
    %c0_i32 = arith.constant 0 : i32
    %c0_i32_0 = arith.constant 0 : i32
    %c0_i32_1 = arith.constant 0 : i32
    return %c0_i32, %c0_i32_0 : i32, i32
  }
  func.func @transform_4(%arg0: i32) -> (i32, i32) {
    %c0_i32 = arith.constant 0 : i32
    %c0_i32_0 = arith.constant 0 : i32
    %c0_i32_1 = arith.constant 0 : i32
    return %c0_i32, %c0_i32_0 : i32, i32
  }
  func.func @transform_5(%arg0: i32) -> (i32, i32) {
    %c0_i32 = arith.constant 0 : i32
    %c0_i32_0 = arith.constant 0 : i32
    %c0_i32_1 = arith.constant 0 : i32
    return %c0_i32, %c0_i32_0 : i32, i32
  }
  func.func @transform_6(%arg0: i32) -> (i32, i32) {
    %c0_i32 = arith.constant 0 : i32
    %c0_i32_0 = arith.constant 0 : i32
    %c0_i32_1 = arith.constant 0 : i32
    return %c0_i32, %c0_i32_0 : i32, i32
  }
  func.func @transform_7(%arg0: i32) -> (i32, i32) {
    %c0_i32 = arith.constant 0 : i32
    %c0_i32_0 = arith.constant 0 : i32
    %c0_i32_1 = arith.constant 0 : i32
    return %c0_i32, %c0_i32_0 : i32, i32
  }
  func.func @transform_8(%arg0: i32) -> (i32, i32) {
    %c0_i32 = arith.constant 0 : i32
    %c0_i32_0 = arith.constant 0 : i32
    %c0_i32_1 = arith.constant 0 : i32
    return %c0_i32, %c0_i32_0 : i32, i32
  }
  func.func @transform_9(%arg0: i32) -> (i32, i32) {
    %c0_i32 = arith.constant 0 : i32
    %c0_i32_0 = arith.constant 0 : i32
    return %arg0, %c0_i32 : i32, i32
  }
}

module attributes {stable_mosaic.version = 11 : i64} {
  func.func @_classifier_kernel(%arg0: i32, %arg1: i32, %arg2: memref<8x128xbf16, #tpu.memory_space<vmem>>, %arg3: memref<128x128xbf16, #tpu.memory_space<vmem>>, %arg4: memref<1x128xf32, #tpu.memory_space<vmem>>, %arg5: memref<8x128xf32, #tpu.memory_space<vmem>>) attributes {dimension_semantics = [#tpu.dimension_semantics<parallel>, #tpu.dimension_semantics<parallel>], iteration_bounds = array<i64: 3, 1>, scalar_prefetch = 0 : i64, scratch_operands = 0 : i64, tpu.core_type = #tpu.core_type<tc>, window_params = [{transform_indices = @transform_0, window_bounds = array<i64: 8, 128>}, {transform_indices = @transform_1, window_bounds = array<i64: 128, 128>}, {transform_indices = @transform_2, window_bounds = array<i64: 1, 128>}, {transform_indices = @transform_3, window_bounds = array<i64: 8, 128>}]} {
    %c0 = arith.constant 0 : index
    %c0_0 = arith.constant 0 : index
    %0 = vector.load %arg2[%c0, %c0_0] : memref<8x128xbf16, #tpu.memory_space<vmem>>, vector<8x128xbf16>
    %c0_1 = arith.constant 0 : index
    %c0_2 = arith.constant 0 : index
    %1 = vector.load %arg3[%c0_1, %c0_2] : memref<128x128xbf16, #tpu.memory_space<vmem>>, vector<128x128xbf16>
    %cst = arith.constant dense<0.000000e+00> : vector<8x128xf32>
    %2 = tpu.matmul %0, %1, %cst {dimension_numbers = #tpu.dot_dimension_numbers<[1], [0], [0], [1], [0, 0, 1, 1], [], []>} : vector<8x128xbf16>, vector<128x128xbf16>, vector<8x128xf32> -> vector<8x128xf32>
    %c0_3 = arith.constant 0 : index
    %c0_4 = arith.constant 0 : index
    %3 = vector.load %arg4[%c0_3, %c0_4] : memref<1x128xf32, #tpu.memory_space<vmem>>, vector<1x128xf32>
    %4 = vector.broadcast %3 : vector<1x128xf32> to vector<8x128xf32>
    %5 = arith.addf %2, %4 : vector<8x128xf32>
    %cst_5 = arith.constant -1.500000e+01 : f32
    %cst_6 = arith.constant 1.500000e+01 : f32
    %6 = vector.broadcast %cst_5 : f32 to vector<8x128xf32>
    %7 = arith.maximumf %6, %5 : vector<8x128xf32>
    %8 = vector.broadcast %cst_6 : f32 to vector<8x128xf32>
    %9 = arith.minimumf %8, %7 : vector<8x128xf32>
    %c0_7 = arith.constant 0 : index
    %c0_8 = arith.constant 0 : index
    %10 = vector.load %arg5[%c0_7, %c0_8] : memref<8x128xf32, #tpu.memory_space<vmem>>, vector<8x128xf32>
    tpu.vector_store %arg5[%c0_7, %c0_8], %9 {strides = array<i32>} : memref<8x128xf32, #tpu.memory_space<vmem>>, vector<8x128xf32>,
    return
  }
  func.func @transform_0(%arg0: i32, %arg1: i32) -> (i32, i32) {
    %c0_i32 = arith.constant 0 : i32
    %c0_i32_0 = arith.constant 0 : i32
    return %arg1, %c0_i32 : i32, i32
  }
  func.func @transform_1(%arg0: i32, %arg1: i32) -> (i32, i32) {
    %c0_i32 = arith.constant 0 : i32
    %c0_i32_0 = arith.constant 0 : i32
    return %c0_i32, %arg0 : i32, i32
  }
  func.func @transform_2(%arg0: i32, %arg1: i32) -> (i32, i32) {
    %c0_i32 = arith.constant 0 : i32
    %c0_i32_0 = arith.constant 0 : i32
    return %c0_i32, %arg0 : i32, i32
  }
  func.func @transform_3(%arg0: i32, %arg1: i32) -> (i32, i32) {
    %c0_i32 = arith.constant 0 : i32
    return %arg1, %arg0 : i32, i32
  }
}

</mosaic_0001>

<bundles_post_ra>
// kernel: refined_emb_to_pred.3
= control target key start
LH: loop header
LB: loop body
LE: loop exit
PB: predicated region body
PF: predicated region fallthrough
CT: control target
= control target key end

     0   :  { %8 = vsyncpa [#allocation4], 0  ;;  %s912_s0 = inlined_call_operand.vmem [shape: bf16[8,128], index: 0, kind: input, shape index: {}]   ;;  %s913_s1 = inlined_call_operand.vmem [shape: bf16[128,384], index: 1, kind: input, shape index: {}]   ;;  %s914_s2 = inlined_call_operand.vmem [shape: f32[1,384], index: 2, kind: input, shape index: {}]   ;;  %s915_s3 = inlined_call_operand.hbm [shape: f32[8,384], index: 3, kind: output, shape index: {}]  }
   0x1   :  { %10 = vsyncpa [#allocation4 + $0x1], 0  ;;  %s767_s12 = smov 0   ;;  %s769_s13 = smov 0  }
   0x2   :  { %s771_s14 = smov 0   ;;  %s773_s15 = smov 0  }
   0x3   :  { %s775_s16 = smov 0   ;;  %s777_s17 = smov 0  }
   0x4 LB: > { %s546_s18 = sadd.s32 4294967295, %s742_s17   ;;  %s547_s19 = sadd.s32 4294967294, %s742_s17   ;;  %s742_s17 = sphi %s777_s17, %s16_s17   ;;  %s738_s16 = sphi %s775_s16, %s922_s16   ;;  %s734_s15 = sphi %s773_s15, %s921_s15   ;;  %s730_s14 = sphi %s771_s14, %s920_s14   ;;  %s726_s13 = sphi %s769_s13, %s919_s13   ;;  %s722_s12 = sphi %s767_s12, %s918_s12  }
   0x5   : > { %s28_s20 = sadd.s32 1, %s738_s16  ;;  %s61_s21 = sadd.s32 1, %s730_s14 }
   0x6   : > { %p30_p0 = scmp.ge.s32.totalorder %s28_s20, 3  ;;  %p68_p1 = scmp.ne.s32.totalorder %s730_s14, %s726_s13 }
   0x7   : > { %p69_p2 = scmp.eq.s32.totalorder %s742_s17, 0  ;;  %p126_p3 = scmp.eq.s32.totalorder %s546_s18, 2 }
   0x8   : > { %s924_s20 = smov (%p30_p0, %s28_s20), 0  ;;  %p131_p6 = scmp.ne.s32.totalorder %s726_s13, %s722_s12 }
   0x9   : > { %p70_p4 = por %p69_p2, %p68_p1  ;;  %p806_p5 = por %p126_p3, %p68_p1 }
   0xa   : > { %s58_s23 = ssub.s32 %s738_s16, %s924_s20  ;;  %p132_p8 = scmp.eq.s32.totalorder %s547_s19, 2 }
   0xb   : > { %p59_p7 = scmp.eq.s32.totalorder %s58_s23, 0  ;;  %p550_p10 = scmp.ge.s32.totalorder %s742_s17, 3 }
   0xc   : > { %p817_p9 = por %p132_p8, %p131_p6 }
   0xd   : > { %s815_s24 = scalar_select %p59_p7, %s730_s14, %s61_s21  }
   0xe   : > { %155 = sbr.rel (%p550_p10) target bundleno = 35 (0x23), region = 20 }
  0x15   : > { %158 = sbr.rel (!%p70_p4) target bundleno = 35 (0x23), region = 24  ;;  %s160_s26 = sand.u32 (%p70_p4), 1, %s730_s14  }
  0x16   : > { %s552_s27 = sshll.u32 (%p70_p4), %s738_s16, 2  ;;  %s551_s28 = sshll.u32 (%p70_p4), %s160_s26, 6 }
  0x17   : > { %s827_s4 = scalar_lea.vmem (%p70_p4), %s913_s1, %s552_s27  ;;  %s162_s5 = scalar_lea.vmem (%p70_p4), [#allocation2], %s551_s28 }
  0x18   : > { %v180_v0 = vld [vmem:[%s827_s4] sm:$0xf] (%p70_p4)  ;;  %v182_v1 = vld [vmem:[%s827_s4 + $0xc] sm:$0xf] (%p70_p4)  ;;  %v184_v2 = vld [vmem:[%s827_s4 + $0x18] sm:$0xf] (%p70_p4) }
  0x19   : > { %181 = vst [vmem:[%s162_s5] sm:$0xf] (%p70_p4), %v180_v0  ;;  %183 = vst [vmem:[%s162_s5 + $0x4] sm:$0xf] (%p70_p4), %v182_v1  ;;  %v186_v3 = vld [vmem:[%s827_s4 + $0x24] sm:$0xf] (%p70_p4) }
  0x1a   : > { %v188_v4 = vld [vmem:[%s827_s4 + $0x30] sm:$0xf] (%p70_p4)  ;;  %185 = vst [vmem:[%s162_s5 + $0x8] sm:$0xf] (%p70_p4), %v184_v2  ;;  %187 = vst [vmem:[%s162_s5 + $0xc] sm:$0xf] (%p70_p4), %v186_v3 }
  0x1b   : > { %189 = vst [vmem:[%s162_s5 + $0x10] sm:$0xf] (%p70_p4), %v188_v4  ;;  %v190_v5 = vld [vmem:[%s827_s4 + $0x3c] sm:$0xf] (%p70_p4)  ;;  %v192_v6 = vld [vmem:[%s827_s4 + $0x48] sm:$0xf] (%p70_p4) }
  0x1c   : > { %v194_v7 = vld [vmem:[%s827_s4 + $0x54] sm:$0xf]  ;;  %191 = vst [vmem:[%s162_s5 + $0x14] sm:$0xf] %v190_v5  ;;  %193 = vst [vmem:[%s162_s5 + $0x18] sm:$0xf] %v192_v6 }
  0x1d   : > { %195 = vst [vmem:[%s162_s5 + $0x1c] sm:$0xf] %v194_v7  ;;  %v196_v8 = vld [vmem:[%s827_s4 + $0x60] sm:$0xf]  ;;  %v198_v9 = vld [vmem:[%s827_s4 + $0x6c] sm:$0xf] }
  0x1e   : > { %v200_v10 = vld [vmem:[%s827_s4 + $0x78] sm:$0xf]  ;;  %197 = vst [vmem:[%s162_s5 + $0x20] sm:$0xf] %v196_v8  ;;  %199 = vst [vmem:[%s162_s5 + $0x24] sm:$0xf] %v198_v9 }
  0x1f   : > { %201 = vst [vmem:[%s162_s5 + $0x28] sm:$0xf] %v200_v10  ;;  %v202_v11 = vld [vmem:[%s827_s4 + $0x84] sm:$0xf]  ;;  %v204_v12 = vld [vmem:[%s827_s4 + $0x90] sm:$0xf] }
  0x20   : > { %v206_v13 = vld [vmem:[%s827_s4 + $0x9c] sm:$0xf]  ;;  %203 = vst [vmem:[%s162_s5 + $0x2c] sm:$0xf] %v202_v11  ;;  %205 = vst [vmem:[%s162_s5 + $0x30] sm:$0xf] %v204_v12 }
  0x21   : > { %207 = vst [vmem:[%s162_s5 + $0x34] sm:$0xf] %v206_v13  ;;  %v208_v14 = vld [vmem:[%s827_s4 + $0xa8] sm:$0xf]  ;;  %v210_v15 = vld [vmem:[%s827_s4 + $0xb4] sm:$0xf] }
  0x22   : > { %209 = vst [vmem:[%s162_s5 + $0x38] sm:$0xf] %v208_v14  ;;  %211 = vst [vmem:[%s162_s5 + $0x3c] sm:$0xf] %v210_v15 }
  0x23 PF: > { %p553_p11 = scmp.ge.s32.totalorder %s742_s17, 1  ;;  %p271_p12 = scmp.lt.s32.totalorder %s742_s17, 4 }
  0x25   : > { %p272_p13 = pnand %p553_p11, %p271_p12 }
  0x26   : > { %s848_s6 = sand.u32 (!%p272_p13), 1, %s726_s13   ;;  %v744_v16 = vmov (!%p272_p13), 0.0   ;;  %vm745_vm0 = vmmov (!%p272_p13), 0   ;;  %v316_v25 = vld [vmem:[%s912_s0] sm:$0xf] (!%p272_p13)  ;;  %p312_p0 = scmp.lt.s32.totalorder (!%p272_p13), %s734_s15, 2 }
  0x27   : > { %275 = sbr.rel (%p272_p13) target bundleno = 303 (0x12f), region = 69  ;;  %579 = vmatprep.subr.bf16.mxu0 (!%p272_p13), %v744_v16  ;;  %s554_s7 = sshll.u32 (!%p272_p13), %s848_s6, 6  ;;  %595 = vmatprep.mubr.msk.bf16.mxu0 (!%p272_p13), %vm745_vm0, %v744_v16 }
  0x28   : > { %s280_s8 = scalar_lea.vmem (!%p272_p13), [#allocation2], %s554_s7  ;;  %s555_s18 = sshll.u32 (!%p272_p13), %s848_s6, 3 }
  0x29   : > { %v656_v17 = vld [vmem:[%s280_s8] sm:$0xff] (!%p272_p13)   ;;  %v657_v18 = vld [vmem:[%s280_s8 + $0x8] sm:$0xff] (!%p272_p13)   ;;  %v658_v19 = vld [vmem:[%s280_s8 + $0x10] sm:$0xff] (!%p272_p13)   ;;  %s567_s26 = sshll.u32 (!%p272_p13), %s734_s15, 7  ;;  %s307_s27 = scalar_lea.vmem (!%p272_p13), [#allocation3], %s555_s18 }
  0x2a   : > { %580 = vmatpush3.bf16.msra.mxu0 (!%p272_p13), %v656_v17  ;;  %v659_v20 = vld [vmem:[%s280_s8 + $0x18] sm:$0xff] (!%p272_p13)   ;;  %v660_v21 = vld [vmem:[%s280_s8 + $0x20] sm:$0xff] (!%p272_p13)   ;;  %v661_v22 = vld [vmem:[%s280_s8 + $0x28] sm:$0xff] (!%p272_p13)   ;;  %s447_s28 = sshll.u32 (!%p272_p13), %s307_s27, 4  ;;  %s864_s4 = scalar_lea.hbm (!%p272_p13), %s915_s3, %s567_s26  ;;  %s866_s28 = int_to_ptr.vmem [resolvable:$true] %s447_s28 }
  0x2b   : > { %581 = vmatprep.subr.bf16.mxu0 (!%p272_p13), %v744_v16  ;;  %v662_v23 = vld [vmem:[%s280_s8 + $0x30] sm:$0xff] (!%p272_p13)   ;;  %v663_v24 = vld [vmem:[%s280_s8 + $0x38] sm:$0xff] (!%p272_p13)   ;;  %s432_s5 = scalar_lea.sflag (!%p272_p13), [#allocation4], %s848_s6  ;;  %s746_s7 = smov (!%p272_p13), [#allocation3]  }
  0x2c   : > { %s668_s8 = sshll.u32 (!%p272_p13), %s746_s7, 4  ;;  %s669_s8 = int_to_ptr.vmem [resolvable:$false] %s668_s8 }
  0x2d   : > { %s670_s9 = scalar_lea.vmem (!%p272_p13), %s669_s8, 256  ;;  %p671_p4 = scmp.lt.s32.totalorder (!%p272_p13), %s866_s28, %s669_s8 }
  0x2e   : > { %582 = vmatpush3.bf16.msra.mxu0 %v657_v18  ;;  %s313_s11 = scalar_select %p312_p0, %s734_s15, 2 }
  0x2f   : > { %583 = vmatprep.subr.bf16.mxu0 %v744_v16  ;;  %s664_s15 = scalar_lea.vmem %s866_s28, 128 }
  0x30   : > { %s314_s23 = scalar_lea.vmem %s914_s2, %s313_s11  ;;  %p665_p1 = scmp.ne.s32.totalorder %s866_s28, %s664_s15 }
  0x31   : > { %v556_v26 = vld [vmem:[%s314_s23] ss:$0 sm:$0xff]  ;;  %p672_p6 = scmp.lt.s32.totalorder %s670_s9, %s664_s15 }
  0x32   : > { %584 = vmatpush3.bf16.msra.mxu0 %v658_v19  ;;  %p666_p2 = pnand %p665_p1, %p806_p5 }
  0x33   : > { %585 = vmatprep.subr.bf16.mxu0 %v744_v16  ;;  %p673_p7 = por %p672_p6, %p671_p4 }
  0x34   : > { %p667_p3 = pneg %p666_p2 }
  0x36   : > { %586 = vmatpush3.bf16.msra.mxu0 %v659_v20  ;;  %p674_p8 = pnand %p673_p7, %p667_p3 }
  0x37   : > { %587 = vmatprep.subr.bf16.mxu0 %v744_v16 }
  0x3a   : > { %588 = vmatpush3.bf16.msra.mxu0 %v660_v21 }
  0x3b   : > { %589 = vmatprep.subr.bf16.mxu0 %v744_v16 }
  0x3e   : > { %590 = vmatpush3.bf16.msra.mxu0 %v661_v22 }
  0x3f   : > { %591 = vmatprep.subr.bf16.mxu0 %v744_v16 }
  0x42   : > { %592 = vmatpush3.bf16.msra.mxu0 %v662_v23 }
  0x43   : > { %593 = vmatprep.subr.bf16.mxu0 %v744_v16 }
  0x46   : > { %594 = vmatpush3.bf16.msra.mxu0 %v663_v24 }
  0x49   : > { %596 = vmatmul.mubr.bf16.vlgmr.msra.gmra.mrb[0].mxu0 %v316_v25 }
 0x11c   : > { %v422_v27 = vpop.f32.mrb[0].mxu0 }
 0x11d   : > { %v423_v28 = vadd.f32 %v556_v26, %v422_v27  ;;  %v597_v29 = vpop.f32.mrb[1].mxu0 }
 0x11e   : > { %v425_v30 = vpop.f32.mrb[2].mxu0 }
 0x11f   : > { %v565_v31 = vclamps-f32 %v423_v28, 15.0  ;;  %v598_v32 = vpop.f32.mrb[3].mxu0 }
 0x121   : > { %430 = vst [vmem:[%s307_s27] sm:$0xff] %v565_v31 }
 0x122   : > { %677 = shalt.err (!%p674_p8)
}
 0x123   : > { %s678_s6 = scalar_lea.hbm %s864_s4, 128  ;;  %s682_s18 = scalar_lea.hbm %s915_s3, 384 }
 0x124   : > { %p679_p10 = scmp.ne.s32.totalorder %s864_s4, %s678_s6  ;;  %p683_p13 = scmp.lt.u32.totalorder %s864_s4, %s915_s3 }
 0x125   : > { %p684_p0 = scmp.lt.u32.totalorder %s682_s18, %s678_s6  ;;  %p686_p2 = scmp.lt.u32.totalorder %s678_s6, %s864_s4 }
 0x126   : > { %p680_p11 = pnand %p679_p10, %p806_p5 }
 0x127   : > { %p685_p1 = por %p684_p0, %p683_p13 }
 0x128   : > { %p681_p12 = pneg %p680_p11 }
 0x129   : > { %p687_p3 = por %p686_p2, %p685_p1 }
 0x12b   : > { %p688_p4 = pnand %p687_p3, %p681_p12 }
 0x12d   : > { %691 = shalt.err (!%p688_p4)
}
 0x12e   : > { %599 = dma.vmem_to_hbm [thread:$0]  (%p806_p5), %s866_s28, 128, %s864_s4, %s432_s5  }
 0x12f PF: > { %p605_p6 = scmp.ge.s32.totalorder %s742_s17, 2  ;;  %s459_s23 = sand.u32 1, %s722_s12  }
 0x130   : > { %s460_s26 = scalar_lea.sflag [#allocation4], %s459_s23 }
 0x131   : > { %p602_p7 = pnand %p605_p6, %p817_p9 }
 0x133   : > { %717 = dma.done.wait (!%p602_p7), %s460_s26, 128  }
 0x134   : > { %719 = vsyncadd (!%p602_p7), %s460_s26, 4294967168  ;;  %s16_s17 = sadd.s32 1, %s742_s17   ;;  %s918_s12 = smov %s726_s13 }
 0x135   : > { %p13_p8 = scmp.ge.s32.totalorder %s16_s17, 5   ;;  %s919_s13 = smov %s730_s14 }
 0x136   : > { %s920_s14 = smov %s815_s24  ;;  %s921_s15 = smov %s738_s16 }
 0x137   : > { %s922_s16 = smov %s924_s20  ;;  %15 = sbr.rel (!%p13_p8) target bundleno = 4 (0x4), region = 119 }
 0x13e   :  { %465 = vsyncpa [#allocation4], 1 }
 0x13f   :  { %467 = vsyncpa [#allocation4 + $0x1], 1 }

// kernel: refined_emb_to_pred.2
= control target key start
LH: loop header
LB: loop body
LE: loop exit
PB: predicated region body
PF: predicated region fallthrough
CT: control target
= control target key end

     0   :  { %v71_v36 = vlaneseq  ;;  %s931_s1 = inlined_call_operand.vmem [shape: bf16[256,256], index: 1, kind: input, shape index: {}]   ;;  %s932_s0 = inlined_call_operand.vmem [shape: f32[8,256], index: 0, kind: input, shape index: {}]   ;;  %s933_s2 = inlined_call_operand.vmem [shape: f32[1,256], index: 2, kind: input, shape index: {}]   ;;  %s934_s5 = inlined_call_operand.vmem [shape: bf16[256,128], index: 5, kind: input, shape index: {}]   ;;  %s935_s3 = inlined_call_operand.vmem [shape: f32[1,256], index: 3, kind: input, shape index: {}]   ;;  %s936_s4 = inlined_call_operand.vmem [shape: f32[1,256], index: 4, kind: input, shape index: {}]   ;;  %s937_s6 = inlined_call_operand.vmem [shape: f32[1,128], index: 6, kind: input, shape index: {}]   ;;  %s938_s7 = inlined_call_operand.vmem [shape: f32[1,128], index: 7, kind: input, shape index: {}]   ;;  %s939_s8 = inlined_call_operand.vmem [shape: f32[1,128], index: 8, kind: input, shape index: {}]   ;;  %s940_s9 = inlined_call_operand.vmem [shape: bf16[8,128], index: 9, kind: output, shape index: {}]  }
   0x1   :  { %v626_v0 = vld [vmem:[%s931_s1 + $0x4] ss:$8 sps:$4 sm:$0xff]   ;;  %v628_v1 = vld [vmem:[%s931_s1] ss:$8 sps:$4 sm:$0xff]   ;;  %v629_v2 = vld [vmem:[%s931_s1 + $0x14] ss:$8 sps:$4 sm:$0xff]  }
   0x2   :  { %241 = vmatprep.subr.bf16.mxu0 %v626_v0  ;;  %v631_v3 = vld [vmem:[%s931_s1 + $0x10] ss:$8 sps:$4 sm:$0xff]   ;;  %v632_v4 = vld [vmem:[%s931_s1 + $0x24] ss:$8 sps:$4 sm:$0xff]   ;;  %v634_v5 = vld [vmem:[%s931_s1 + $0x20] ss:$8 sps:$4 sm:$0xff]  }
   0x3   :  { %242 = vmatpush1.bf16.msra.mxu0 %v628_v1  ;;  %v635_v6 = vld [vmem:[%s931_s1 + $0x34] ss:$8 sps:$4 sm:$0xff]   ;;  %v637_v7 = vld [vmem:[%s931_s1 + $0x30] ss:$8 sps:$4 sm:$0xff]   ;;  %v638_v8 = vld [vmem:[%s931_s1 + $0x44] ss:$8 sps:$4 sm:$0xff]  }
   0x4   :  { %243 = vmatprep.subr.bf16.mxu0 %v629_v2  ;;  %v640_v9 = vld [vmem:[%s931_s1 + $0x40] ss:$8 sps:$4 sm:$0xff]   ;;  %v641_v10 = vld [vmem:[%s931_s1 + $0x54] ss:$8 sps:$4 sm:$0xff]   ;;  %v643_v11 = vld [vmem:[%s931_s1 + $0x50] ss:$8 sps:$4 sm:$0xff]  }
   0x5   :  { %v644_v12 = vld [vmem:[%s931_s1 + $0x64] ss:$8 sps:$4 sm:$0xff]   ;;  %v646_v15 = vld [vmem:[%s931_s1 + $0x60] ss:$8 sps:$4 sm:$0xff]   ;;  %v647_v16 = vld [vmem:[%s931_s1 + $0x74] ss:$8 sps:$4 sm:$0xff]  }
   0x6   :  { %v34_v13 = vld [vmem:[%s932_s0 + $0x8] sm:$0xff]  ;;  %v649_v17 = vld [vmem:[%s931_s1 + $0x70] ss:$8 sps:$4 sm:$0xff]   ;;  %v653_v20 = vld [vmem:[%s931_s1 + $0x94] ss:$8 sps:$4 sm:$0xff]   ;;  %v72_v37 = vshrl.u32 %v71_v36, 7 }
   0x7   :  { %244 = vmatpush1.bf16.msra.mxu0 %v631_v3  ;;  %v36_v14 = vpack.c.bf16 %v34_v13, %v34_v13  ;;  %v650_v18 = vld [vmem:[%s931_s1 + $0x84] ss:$8 sps:$4 sm:$0xff]   ;;  %v652_v19 = vld [vmem:[%s931_s1 + $0x80] ss:$8 sps:$4 sm:$0xff]   ;;  %v655_v21 = vld [vmem:[%s931_s1 + $0x90] ss:$8 sps:$4 sm:$0xff]  }
   0x8   :  { %245 = vmatprep.subr.bf16.mxu0 %v632_v4  ;;  %v656_v22 = vld [vmem:[%s931_s1 + $0xa4] ss:$8 sps:$4 sm:$0xff]   ;;  %v658_v23 = vld [vmem:[%s931_s1 + $0xa0] ss:$8 sps:$4 sm:$0xff]   ;;  %v659_v24 = vld [vmem:[%s931_s1 + $0xb4] ss:$8 sps:$4 sm:$0xff]  }
   0x9   :  { %273 = vmatprep.mubr.bf16.mxu0 %v36_v14  ;;  %v661_v25 = vld [vmem:[%s931_s1 + $0xb0] ss:$8 sps:$4 sm:$0xff]   ;;  %v662_v26 = vld [vmem:[%s931_s1 + $0xc4] ss:$8 sps:$4 sm:$0xff]   ;;  %v664_v27 = vld [vmem:[%s931_s1 + $0xc0] ss:$8 sps:$4 sm:$0xff]  }
   0xa   :  { %v665_v28 = vld [vmem:[%s931_s1 + $0xd4] ss:$8 sps:$4 sm:$0xff]   ;;  %v667_v29 = vld [vmem:[%s931_s1 + $0xd0] ss:$8 sps:$4 sm:$0xff]   ;;  %v668_v30 = vld [vmem:[%s931_s1 + $0xe4] ss:$8 sps:$4 sm:$0xff]  }
   0xb   :  { %246 = vmatpush1.bf16.msra.mxu0 %v634_v5  ;;  %v670_v31 = vld [vmem:[%s931_s1 + $0xe0] ss:$8 sps:$4 sm:$0xff]   ;;  %v671_v32 = vld [vmem:[%s931_s1 + $0xf4] ss:$8 sps:$4 sm:$0xff]   ;;  %v673_v33 = vld [vmem:[%s931_s1 + $0xf0] ss:$8 sps:$4 sm:$0xff]  }
   0xc   :  { %247 = vmatprep.subr.bf16.mxu0 %v635_v6  ;;  %v33_v34 = vld [vmem:[%s932_s0] sm:$0xff]  ;;  %v852_v38 = vsub.s32 0, %v72_v37  ;;  %v857_v40 = vsub.s32 1, %v72_v37  ;;  %v676_v59 = vld [vmem:[%s934_s5 + $0x48] sm:$0xff]   ;;  %v678_v61 = vld [vmem:[%s934_s5 + $0x50] sm:$0xff]  }
   0xd   :  { %v35_v35 = vpack.c.bf16 %v33_v34, %v33_v34  ;;  %v69_v39 = vld [vmem:[%s933_s2] sm:$0x3]  ;;  %v677_v60 = vld [vmem:[%s934_s5 + $0x8] sm:$0xff]   ;;  %v679_v62 = vld [vmem:[%s934_s5 + $0x10] sm:$0xff]  }
   0xe   :  { %v74_v41 = vrot.slane %v69_v39, %v852_v38  ;;  %v78_v42 = vrot.slane %v69_v39, %v857_v40  ;;  %v674_v57 = vld [vmem:[%s934_s5 + $0x40] sm:$0xff]   ;;  %v680_v63 = vld [vmem:[%s934_s5 + $0x58] sm:$0xff]   ;;  %v684_v3 = vld [vmem:[%s934_s5 + $0x68] sm:$0xff]  }
   0xf   :  { %248 = vmatpush1.bf16.msra.mxu0 %v637_v7  ;;  %v675_v58 = vld [vmem:[%s934_s5] sm:$0xff]   ;;  %604 = vmatprep.subr.bf16.mxu1 %v674_v57  ;;  %v681_v0 = vld [vmem:[%s934_s5 + $0x18] sm:$0xff]   ;;  %v685_v4 = vld [vmem:[%s934_s5 + $0x28] sm:$0xff]  }
  0x10   :  { %249 = vmatprep.subr.bf16.mxu0 %v638_v8  ;;  %605 = vmatpush3.bf16.msra.mxu1 %v675_v58  ;;  %v682_v1 = vld [vmem:[%s934_s5 + $0x60] sm:$0xff]   ;;  %v686_v5 = vld [vmem:[%s934_s5 + $0x70] sm:$0xff]   ;;  %v688_v7 = vld [vmem:[%s934_s5 + $0x78] sm:$0xff]  }
  0x11   :  { %606 = vmatprep.subr.bf16.mxu1 %v676_v59  ;;  %v683_v2 = vld [vmem:[%s934_s5 + $0x20] sm:$0xff]   ;;  %v687_v6 = vld [vmem:[%s934_s5 + $0x30] sm:$0xff]   ;;  %v689_v8 = vld [vmem:[%s934_s5 + $0x38] sm:$0xff]  }
  0x12   :  { %v283_v13 = vld [vmem:[%s936_s4] sm:$0x3] }
  0x13   :  { %250 = vmatpush1.bf16.msra.mxu0 %v640_v9  ;;  %v585_v39 = vld [vmem:[%s937_s6] ss:$0 sm:$0xff] }
  0x14   :  { %251 = vmatprep.subr.bf16.mxu0 %v641_v10  ;;  %607 = vmatpush3.bf16.msra.mxu1 %v677_v60 }
  0x15   :  { %608 = vmatprep.subr.bf16.mxu1 %v678_v61 }
  0x17   :  { %252 = vmatpush1.bf16.msra.mxu0 %v643_v11 }
  0x18   :  { %253 = vmatprep.subr.bf16.mxu0 %v644_v12  ;;  %609 = vmatpush3.bf16.msra.mxu1 %v679_v62  ;;  %v282_v12 = vld [vmem:[%s935_s3] sm:$0x3] }
  0x19   :  { %610 = vmatprep.subr.bf16.mxu1 %v680_v63  ;;  %v305_v14 = vrot.slane %v282_v12, %v852_v38 }
  0x1b   :  { %254 = vmatpush1.bf16.msra.mxu0 %v646_v15  ;;  %v309_v15 = vrot.slane %v282_v12, %v857_v40 }
  0x1c   :  { %255 = vmatprep.subr.bf16.mxu0 %v647_v16  ;;  %611 = vmatpush3.bf16.msra.mxu1 %v681_v0 }
  0x1d   :  { %612 = vmatprep.subr.bf16.mxu1 %v682_v1 }
  0x1f   :  { %256 = vmatpush1.bf16.msra.mxu0 %v649_v17 }
  0x20   :  { %257 = vmatprep.subr.bf16.mxu0 %v650_v18  ;;  %613 = vmatpush3.bf16.msra.mxu1 %v683_v2 }
  0x21   :  { %614 = vmatprep.subr.bf16.mxu1 %v684_v3 }
  0x23   :  { %258 = vmatpush1.bf16.msra.mxu0 %v652_v19  ;;  %v318_v19 = vrot.slane %v283_v13, %v852_v38 }
  0x24   :  { %259 = vmatprep.subr.bf16.mxu0 %v653_v20  ;;  %615 = vmatpush3.bf16.msra.mxu1 %v685_v4  ;;  %v322_v20 = vrot.slane %v283_v13, %v857_v40 }
  0x25   :  { %616 = vmatprep.subr.bf16.mxu1 %v686_v5 }
  0x27   :  { %260 = vmatpush1.bf16.msra.mxu0 %v655_v21 }
  0x28   :  { %261 = vmatprep.subr.bf16.mxu0 %v656_v22  ;;  %617 = vmatpush3.bf16.msra.mxu1 %v687_v6 }
  0x29   :  { %618 = vmatprep.subr.bf16.mxu1 %v688_v7 }
  0x2b   :  { %262 = vmatpush1.bf16.msra.mxu0 %v658_v23 }
  0x2c   :  { %263 = vmatprep.subr.bf16.mxu0 %v659_v24  ;;  %619 = vmatpush3.bf16.msra.mxu1 %v689_v8 }
  0x2f   :  { %264 = vmatpush1.bf16.msra.mxu0 %v661_v25 }
  0x30   :  { %265 = vmatprep.subr.bf16.mxu0 %v662_v26 }
  0x33   :  { %266 = vmatpush1.bf16.msra.mxu0 %v664_v27 }
  0x34   :  { %267 = vmatprep.subr.bf16.mxu0 %v665_v28 }
  0x37   :  { %268 = vmatpush1.bf16.msra.mxu0 %v667_v29 }
  0x38   :  { %269 = vmatprep.subr.bf16.mxu0 %v668_v30 }
  0x3b   :  { %270 = vmatpush1.bf16.msra.mxu0 %v670_v31 }
  0x3c   :  { %271 = vmatprep.subr.bf16.mxu0 %v671_v32 }
  0x3f   :  { %272 = vmatpush1.bf16.msra.mxu0 %v673_v33 }
  0x42   :  { %274 = vmatmul.mubr.bf16.vlgmr.msra.gmra.mrb[0].mxu0 %v35_v35 }
 0x115   :  { %v275_v43 = vpop.f32.mrb[0].mxu0 }
 0x116   :  { %v276_v44 = vadd.f32 %v275_v43, %v74_v41  ;;  %v277_v45 = vpop.f32.mrb[1].mxu0 }
 0x117   :  { %v278_v46 = vadd.f32 %v277_v45, %v78_v42  ;;  %v279_v47 = vpop.f32.mrb[2].mxu0 }
 0x118   :  { %v280_v48 = vpop.f32.mrb[3].mxu0 }
 0x119   :  { %v284_v49 = vadd.f32 %v278_v46, %v276_v44 }
 0x11b   :  { %285 = vadd.xlane.f32.xlu0 %v284_v49 }
 0x1a8   :  { %v286_v50 = vpop.xlane.xlu0 %285 }
 0x1a9   :  { %v288_v51 = vmul.f32 0.00390625, %v286_v50 }
 0x1ab   :  { %v289_v52 = vsub.f32 %v276_v44, %v288_v51  ;;  %v290_v53 = vsub.f32 %v278_v46, %v288_v51 }
 0x1ad   :  { %v291_v54 = vmul.f32 %v289_v52, %v289_v52  ;;  %v292_v55 = vmul.f32 %v290_v53, %v290_v53 }
 0x1af   :  { %v293_v56 = vadd.f32 %v292_v55, %v291_v54  ;;  %v603_v54 = vld [vmem:[%s939_s8] ss:$0 sm:$0xff] }
 0x1b1   :  { %294 = vadd.xlane.f32.xlu0 %v293_v56 }
 0x23e   :  { %v295_v9 = vpop.xlane.xlu0 %294 }
 0x23f   :  { %v296_v10 = vmul.f32 0.00390625, %v295_v9 }
 0x241   :  { %v297_v11 = vadd.f32 1e-05, %v296_v10 }
 0x243   :  { %690 = vrsqrt.f32 %v297_v11 }
 0x24d   :  { %v691_v16 = vpop.eup %690 }
 0x24e   :  { %v299_v17 = vmul.f32 %v691_v16, %v289_v52  ;;  %v300_v18 = vmul.f32 %v691_v16, %v290_v53  ;;  %v602_v52 = vld [vmem:[%s938_s7] ss:$0 sm:$0xff] }
 0x250   :  { %v313_v21 = vmul.f32 %v309_v15, %v300_v18  ;;  %v312_v22 = vmul.f32 %v305_v14, %v299_v17 }
 0x252   :  { %v326_v23 = vadd.f32 %v322_v20, %v313_v21  ;;  %v325_v24 = vadd.f32 %v318_v19, %v312_v22 }
 0x254   :  { %v330_v25 = vmul.f32 0.70710677, %v326_v23  ;;  %v329_v26 = vmul.f32 0.70710677, %v325_v24  ;;  %v328_v29 = vmul.f32 0.5, %v326_v23  ;;  %v327_v31 = vmul.f32 0.5, %v325_v24 }
 0x256   :  { %692 = verf.f32 %v330_v25 }
 0x257   :  { %694 = verf.f32 %v329_v26 }
 0x260   :  { %v693_v27 = vpop.eup %692 }
 0x261   :  { %v695_v28 = vpop.eup %694  ;;  %v334_v30 = vadd.f32 1.0, %v693_v27 }
 0x262   :  { %v333_v32 = vadd.f32 1.0, %v695_v28 }
 0x263   :  { %v336_v33 = vmul.f32 %v334_v30, %v328_v29 }
 0x264   :  { %v335_v34 = vmul.f32 %v333_v32, %v327_v31 }
 0x265   :  { %v338_v35 = vpack.c.bf16 %v336_v33, %v336_v33 }
 0x266   :  { %v337_v36 = vpack.c.bf16 %v335_v34, %v335_v34 }
 0x267   :  { %506 = vmatprep.mubr.bf16.mxu1 %v338_v35 }
 0x268   :  { %507 = vmatmul.mubr.bf16.vlgmr.msra.gmra.mrb[0].mxu1 %v337_v36 }
 0x33b   :  { %v620_v37 = vpop.f32.mrb[0].mxu1 }
 0x33c   :  { %v621_v38 = vpop.f32.mrb[1].mxu1 }
 0x33d   :  { %v622_v40 = vadd.f32 %v621_v38, %v620_v37  ;;  %v623_v41 = vpop.f32.mrb[2].mxu1 }
 0x33e   :  { %v624_v42 = vpop.f32.mrb[3].mxu1 }
 0x33f   :  { %v509_v43 = vadd.f32 %v622_v40, %v585_v39 }
 0x341   :  { %516 = vadd.xlane.f32.xlu1 %v509_v43 }
 0x3ce   :  { %v517_v44 = vpop.xlane.xlu1 %516 }
 0x3cf   :  { %v519_v45 = vmul.f32 0.0078125, %v517_v44 }
 0x3d1   :  { %v520_v46 = vsub.f32 %v509_v43, %v519_v45 }
 0x3d3   :  { %v521_v47 = vmul.f32 %v520_v46, %v520_v46 }
 0x3d5   :  { %522 = vadd.xlane.f32.xlu1 %v521_v47 }
 0x462   :  { %v523_v48 = vpop.xlane.xlu1 %522 }
 0x463   :  { %v524_v49 = vmul.f32 0.0078125, %v523_v48 }
 0x465   :  { %v525_v50 = vadd.f32 1e-05, %v524_v49 }
 0x467   :  { %696 = vrsqrt.f32 %v525_v50 }
 0x471   :  { %v697_v51 = vpop.eup %696 }
 0x472   :  { %v527_v53 = vmul.f32 %v697_v51, %v520_v46 }
 0x474   :  { %v534_v55 = vmul.f32 %v602_v52, %v527_v53 }
 0x476   :  { %v541_v56 = vadd.f32 %v603_v54, %v534_v55 }
 0x478   :  { %v543_v57 = vmul.f32 0.70710677, %v541_v56  ;;  %v542_v59 = vmul.f32 0.5, %v541_v56 }
 0x47a   :  { %698 = verf.f32 %v543_v57 }
 0x484   :  { %v699_v58 = vpop.eup %698 }
 0x485   :  { %v545_v60 = vadd.f32 1.0, %v699_v58 }
 0x487   :  { %v546_v61 = vmul.f32 %v545_v60, %v542_v59 }
 0x489   :  { %v547_v62 = vpack.c.bf16 %v546_v61, %v546_v61 }
 0x48b   :  { %548 = vst [vmem:[%s940_s9] sm:$0xf] %v547_v62 }

</bundles_post_ra>
